<compile_context>
chip_gen: v5e
topology: v5e:2x2
jax: 0.10.0
libtpu: 0.0.40
codegen_flags: <defaults>
</compile_context>

<pallas_src>
import functools

import jax
import jax.numpy as jnp
import numpy as np
from jax.experimental import pallas as pl
from jax.experimental.pallas import tpu as pltpu

IGNORE_LABEL = 255
NUM_CLASSES = 19
# Deterministic "parameters": the cityscapes class-balance weights from __init__.
CLASS_WEIGHT = np.array(
    [0.8373, 0.918, 0.866, 1.0345, 1.0166, 0.9969, 0.9754, 1.0489, 0.8786,
     1.0023, 0.9539, 0.9843, 1.1116, 0.9037, 1.0865, 1.0955, 1.0865, 1.1529,
     1.0507], dtype=np.float32)


def _round_up(x, m):
    return ((x + m - 1) // m) * m


def _fused_ce_kernel(logits_ref, labels_ref, prob_ref, wnll_ref, cw_ref, *,
                     class_weight):
    """One pass over a (C, BLOCK_PIX) logits tile (classes on sublanes, pixels on lanes).

    Emits per-pixel target-class softmax prob, class-weighted NLL, and the class weight.
    """
    x = logits_ref[...].astype(jnp.float32)                    # (C, BP)
    lab = labels_ref[...]                                      # (1, BP) int32

    # log-softmax over the class (sublane) axis.
    m = jnp.max(x, axis=0, keepdims=True)                      # (1, BP)
    e = jnp.exp(x - m)
    lse = jnp.log(jnp.sum(e, axis=0, keepdims=True)) + m       # (1, BP)
    logp = x - lse                                             # (C, BP)

    cls = jax.lax.broadcasted_iota(jnp.int32, x.shape, 0)      # (C, BP)
    onehot = (cls == lab).astype(jnp.float32)                  # all-zero for ignore/pad
    nll = -jnp.sum(logp * onehot, axis=0, keepdims=True)       # (1, BP), 0 if ignored

    # Class weight baked in as compile-time scalar constants (no weight DMA stream):
    # cw = class_weight[label]; 0 for ignore-label / padded pixels.
    cw = jnp.zeros_like(nll)
    for k, wk in enumerate(class_weight):
        cw = jnp.where(lab == k, jnp.float32(wk), cw)

    prob_ref[...] = jnp.exp(-nll)          # softmax prob of target class (EUP slot)
    wnll_ref[...] = cw * nll
    cw_ref[...] = cw


def ohem_cross_entropy_2d(predict, target, *, thresh=0.6, min_kept=0,
                          ignore_label=IGNORE_LABEL, class_weight=CLASS_WEIGHT,
                          block_pix=8192):
    assert predict.ndim == 4 and target.ndim == 3
    n, c, h, w = predict.shape
    assert target.shape == (n, h, w)
    hw = h * w

    # Native NCHW order, just flattened to (n, c, h*w).  No HBM transpose.
    logits = predict.reshape(n, c, hw).astype(jnp.float32)
    labels = target.reshape(n, 1, hw).astype(jnp.int32)

    # Pixel (lane) block size: multiple of 128, clamped to the (padded) image size.
    bp = _round_up(min(block_pix, _round_up(hw, 128)), 128)
    hw_pad = _round_up(hw, bp)
    if hw_pad != hw:
        logits = jnp.pad(logits, ((0, 0), (0, 0), (0, hw_pad - hw)))
        labels = jnp.pad(labels, ((0, 0), (0, 0), (0, hw_pad - hw)),
                         constant_values=ignore_label)

    grid = (n, hw_pad // bp)
    kernel = functools.partial(
        _fused_ce_kernel,
        class_weight=tuple(float(v) for v in np.asarray(class_weight, np.float32)))

    def vec_spec():
        # (n, 1, hw_pad) arrays; leading batch dim squeezed out of the kernel view.
        return pl.BlockSpec((None, 1, bp), lambda b, i: (b, 0, i))

    prob, wnll, cw = pl.pallas_call(
        kernel,
        out_shape=(jax.ShapeDtypeStruct((n, 1, hw_pad), jnp.float32),
                   jax.ShapeDtypeStruct((n, 1, hw_pad), jnp.float32),
                   jax.ShapeDtypeStruct((n, 1, hw_pad), jnp.float32)),
        grid_spec=pltpu.PrefetchScalarGridSpec(
            num_scalar_prefetch=0, grid=grid,
            in_specs=[pl.BlockSpec((None, c, bp), lambda b, i: (b, 0, i)),
                      vec_spec()],
            out_specs=[vec_spec(), vec_spec(), vec_spec()]),
        compiler_params=pltpu.CompilerParams(
            dimension_semantics=("parallel", "parallel")),
    )(logits, labels)

    # ---- OHEM threshold selection + final masked weighted mean (small JAX glue) ----
    labels_flat = labels.reshape(-1)
    prob_flat = prob.reshape(-1)
    wnll_flat = wnll.reshape(-1)
    cw_flat = cw.reshape(-1)

    valid = labels_flat != ignore_label
    num_valid = jnp.sum(valid.astype(jnp.int32))

    if min_kept > 0:
        # k-th smallest target prob among valid pixels via top_k (O(P), no full sort).
        k = int(min(min_kept, labels_flat.shape[0]))
        neg = jnp.where(valid, -prob_flat, -jnp.inf)
        topk_vals, _ = jax.lax.top_k(neg, k)
        k_idx = jnp.clip(jnp.minimum(num_valid, min_kept) - 1, 0, k - 1)
        pred_k = -topk_vals[k_idx]
        threshold = jnp.where(pred_k > thresh, pred_k, jnp.float32(thresh))
    else:
        threshold = jnp.float32(thresh)

    # Hard-example filtering only applies when num_valid > min_kept (PyTorch semantics).
    apply_ohem = num_valid > min_kept
    kept = jnp.where(apply_ohem, valid & (prob_flat <= threshold), valid)
    kept_f = kept.astype(jnp.float32)

    num = jnp.sum(kept_f * wnll_flat)
    den = jnp.sum(kept_f * cw_flat)
    # Guard den == 0 (nothing kept): return 0 instead of NaN.
    return jnp.where(den > 0,
                     num / jnp.where(den > 0, den, jnp.float32(1.0)),
                     jnp.float32(0.0))


def _reference_loss(predict, target, thresh, min_kept, ignore_label, weight):
    """Pure numpy re-implementation of the PyTorch forward (for verification)."""
    predict = np.asarray(predict, dtype=np.float32)
    target = np.asarray(target)
    n, c, h, w = predict.shape
    logits = np.transpose(predict, (0, 2, 3, 1)).reshape(-1, c)
    labels = target.reshape(-1).astype(np.int64)
    x = logits - logits.max(axis=1, keepdims=True)
    prob = np.exp(x)
    prob /= prob.sum(axis=1, keepdims=True)
    valid = labels != ignore_label
    num_valid = int(valid.sum())
    kept = valid.copy()
    if min_kept < num_valid and num_valid > 0:
        safe_lab = np.clip(labels, 0, c - 1)
        pred = prob[np.arange(len(labels)), safe_lab]
        pred_v = pred[valid]
        threshold = thresh
        if min_kept > 0:
            idx = np.argsort(pred_v)
            ti = idx[min(len(idx), min_kept) - 1]
            if pred_v[ti] > thresh:
                threshold = pred_v[ti]
        kept = valid & (pred <= threshold)
    logp = x - np.log(np.exp(x).sum(axis=1, keepdims=True))
    wvec = np.asarray(weight, dtype=np.float32)
    num, den = 0.0, 0.0
    for i in range(len(labels)):
        if kept[i]:
            num += -logp[i, labels[i]] * wvec[labels[i]]
            den += wvec[labels[i]]
    return num / den


if __name__ == "__main__":
    key = jax.random.PRNGKey(0)
    k1, k2, k3 = jax.random.split(key, 3)

    n, c, h, w = 2, NUM_CLASSES, 16, 16
    predict = jax.random.normal(k1, (n, c, h, w), dtype=jnp.float32)
    labels = jax.random.randint(k2, (n, h, w), 0, NUM_CLASSES, dtype=jnp.int32)
    # Randomly mark ~10% of pixels as ignore (255).
    ignore_mask = jax.random.bernoulli(k3, 0.1, (n, h, w))
    target = jnp.where(ignore_mask, IGNORE_LABEL, labels).astype(jnp.int32)

    thresh, min_kept = 0.7, 100

    loss = ohem_cross_entropy_2d(predict, target, thresh=thresh, min_kept=min_kept)
    loss = jax.block_until_ready(loss)

    ref = _reference_loss(predict, target, thresh, min_kept, IGNORE_LABEL, CLASS_WEIGHT)
    np.testing.assert_allclose(np.array(loss), ref, rtol=1e-3, atol=1e-4)

    print("KERNEL_OK")
</pallas_src>

<mosaic_0001>
module attributes {stable_mosaic.version = 11 : i64} {
  func.func @_fused_ce_kernel(%arg0: i32, %arg1: i32, %arg2: memref<1x19x256xf32, #tpu.memory_space<vmem>>, %arg3: memref<1x1x256xi32, #tpu.memory_space<vmem>>, %arg4: memref<1x1x256xf32, #tpu.memory_space<vmem>>, %arg5: memref<1x1x256xf32, #tpu.memory_space<vmem>>, %arg6: memref<1x1x256xf32, #tpu.memory_space<vmem>>) attributes {dimension_semantics = [#tpu.dimension_semantics<parallel>, #tpu.dimension_semantics<parallel>], iteration_bounds = array<i64: 2, 1>, scalar_prefetch = 0 : i64, scratch_operands = 0 : i64, tpu.core_type = #tpu.core_type<tc>, window_params = [{transform_indices = @transform_0, window_bounds = array<i64: 1, 19, 256>}, {transform_indices = @transform_1, window_bounds = array<i64: 1, 1, 256>}, {transform_indices = @transform_2, window_bounds = array<i64: 1, 1, 256>}, {transform_indices = @transform_3, window_bounds = array<i64: 1, 1, 256>}, {transform_indices = @transform_4, window_bounds = array<i64: 1, 1, 256>}]} {
    %c0 = arith.constant 0 : index
    %c0_0 = arith.constant 0 : index
    %c0_1 = arith.constant 0 : index
    %0 = vector.load %arg2[%c0, %c0_0, %c0_1] : memref<1x19x256xf32, #tpu.memory_space<vmem>>, vector<1x19x256xf32>
    %1 = vector.shape_cast %0 : vector<1x19x256xf32> to vector<19x256xf32>
    %c0_2 = arith.constant 0 : index
    %c0_3 = arith.constant 0 : index
    %c0_4 = arith.constant 0 : index
    %2 = vector.load %arg3[%c0_2, %c0_3, %c0_4] : memref<1x1x256xi32, #tpu.memory_space<vmem>>, vector<1x1x256xi32>
    %3 = vector.shape_cast %2 : vector<1x1x256xi32> to vector<1x256xi32>
    %cst = arith.constant dense<0xFF800000> : vector<256xf32>
    %4 = vector.multi_reduction <maximumf>, %1, %cst [0] : vector<19x256xf32> to vector<256xf32>
    %5 = vector.shape_cast %4 : vector<256xf32> to vector<1x256xf32>
    %6 = vector.broadcast %5 : vector<1x256xf32> to vector<19x256xf32>
    %7 = arith.subf %1, %6 : vector<19x256xf32>
    %8 = math.exp %7 : vector<19x256xf32>
    %cst_5 = arith.constant dense<0.000000e+00> : vector<256xf32>
    %9 = vector.multi_reduction <add>, %8, %cst_5 [0] : vector<19x256xf32> to vector<256xf32>
    %10 = vector.shape_cast %9 : vector<256xf32> to vector<1x256xf32>
    %11 = math.log %10 : vector<1x256xf32>
    %12 = arith.addf %11, %5 : vector<1x256xf32>
    %13 = vector.broadcast %12 : vector<1x256xf32> to vector<19x256xf32>
    %14 = arith.subf %1, %13 : vector<19x256xf32>
    %15 = tpu.iota {dimensions = array<i32: 0>} : vector<19x256xi32>
    %16 = vector.broadcast %3 : vector<1x256xi32> to vector<19x256xi32>
    %17 = arith.cmpi eq, %15, %16 : vector<19x256xi32>
    %18 = arith.extui %17 : vector<19x256xi1> to vector<19x256xi32>
    %19 = arith.sitofp %18 : vector<19x256xi32> to vector<19x256xf32>
    %20 = arith.mulf %14, %19 : vector<19x256xf32>
    %cst_6 = arith.constant dense<0.000000e+00> : vector<256xf32>
    %21 = vector.multi_reduction <add>, %20, %cst_6 [0] : vector<19x256xf32> to vector<256xf32>
    %22 = vector.shape_cast %21 : vector<256xf32> to vector<1x256xf32>
    %cst_7 = arith.constant 0.000000e+00 : f32
    %23 = vector.broadcast %cst_7 : f32 to vector<1x256xf32>
    %24 = arith.subf %23, %22 : vector<1x256xf32>
    %cst_8 = arith.constant 0.000000e+00 : f32
    %25 = vector.broadcast %cst_8 : f32 to vector<1x256xf32>
    %c0_i32 = arith.constant 0 : i32
    %26 = vector.broadcast %c0_i32 : i32 to vector<1x256xi32>
    %27 = arith.cmpi eq, %3, %26 : vector<1x256xi32>
    %cst_9 = arith.constant 8.373000e-01 : f32
    %28 = vector.broadcast %cst_9 : f32 to vector<1x256xf32>
    %29 = arith.select %27, %28, %25 : vector<1x256xi1>, vector<1x256xf32>
    %c1_i32 = arith.constant 1 : i32
    %30 = vector.broadcast %c1_i32 : i32 to vector<1x256xi32>
    %31 = arith.cmpi eq, %3, %30 : vector<1x256xi32>
    %cst_10 = arith.constant 9.180000e-01 : f32
    %32 = vector.broadcast %cst_10 : f32 to vector<1x256xf32>
    %33 = arith.select %31, %32, %29 : vector<1x256xi1>, vector<1x256xf32>
    %c2_i32 = arith.constant 2 : i32
    %34 = vector.broadcast %c2_i32 : i32 to vector<1x256xi32>
    %35 = arith.cmpi eq, %3, %34 : vector<1x256xi32>
    %cst_11 = arith.constant 0.865999996 : f32
    %36 = vector.broadcast %cst_11 : f32 to vector<1x256xf32>
    %37 = arith.select %35, %36, %33 : vector<1x256xi1>, vector<1x256xf32>
    %c3_i32 = arith.constant 3 : i32
    %38 = vector.broadcast %c3_i32 : i32 to vector<1x256xi32>
    %39 = arith.cmpi eq, %3, %38 : vector<1x256xi32>
    %cst_12 = arith.constant 1.034500e+00 : f32
    %40 = vector.broadcast %cst_12 : f32 to vector<1x256xf32>
    %41 = arith.select %39, %40, %37 : vector<1x256xi1>, vector<1x256xf32>
    %c4_i32 = arith.constant 4 : i32
    %42 = vector.broadcast %c4_i32 : i32 to vector<1x256xi32>
    %43 = arith.cmpi eq, %3, %42 : vector<1x256xi32>
    %cst_13 = arith.constant 1.016600e+00 : f32
    %44 = vector.broadcast %cst_13 : f32 to vector<1x256xf32>
    %45 = arith.select %43, %44, %41 : vector<1x256xi1>, vector<1x256xf32>
    %c5_i32 = arith.constant 5 : i32
    %46 = vector.broadcast %c5_i32 : i32 to vector<1x256xi32>
    %47 = arith.cmpi eq, %3, %46 : vector<1x256xi32>
    %cst_14 = arith.constant 9.969000e-01 : f32
    %48 = vector.broadcast %cst_14 : f32 to vector<1x256xf32>
    %49 = arith.select %47, %48, %45 : vector<1x256xi1>, vector<1x256xf32>
    %c6_i32 = arith.constant 6 : i32
    %50 = vector.broadcast %c6_i32 : i32 to vector<1x256xi32>
    %51 = arith.cmpi eq, %3, %50 : vector<1x256xi32>
    %cst_15 = arith.constant 0.975399971 : f32
    %52 = vector.broadcast %cst_15 : f32 to vector<1x256xf32>
    %53 = arith.select %51, %52, %49 : vector<1x256xi1>, vector<1x256xf32>
    %c7_i32 = arith.constant 7 : i32
    %54 = vector.broadcast %c7_i32 : i32 to vector<1x256xi32>
    %55 = arith.cmpi eq, %3, %54 : vector<1x256xi32>
    %cst_16 = arith.constant 1.048900e+00 : f32
    %56 = vector.broadcast %cst_16 : f32 to vector<1x256xf32>
    %57 = arith.select %55, %56, %53 : vector<1x256xi1>, vector<1x256xf32>
    %c8_i32 = arith.constant 8 : i32
    %58 = vector.broadcast %c8_i32 : i32 to vector<1x256xi32>
    %59 = arith.cmpi eq, %3, %58 : vector<1x256xi32>
    %cst_17 = arith.constant 8.786000e-01 : f32
    %60 = vector.broadcast %cst_17 : f32 to vector<1x256xf32>
    %61 = arith.select %59, %60, %57 : vector<1x256xi1>, vector<1x256xf32>
    %c9_i32 = arith.constant 9 : i32
    %62 = vector.broadcast %c9_i32 : i32 to vector<1x256xi32>
    %63 = arith.cmpi eq, %3, %62 : vector<1x256xi32>
    %cst_18 = arith.constant 1.002300e+00 : f32
    %64 = vector.broadcast %cst_18 : f32 to vector<1x256xf32>
    %65 = arith.select %63, %64, %61 : vector<1x256xi1>, vector<1x256xf32>
    %c10_i32 = arith.constant 10 : i32
    %66 = vector.broadcast %c10_i32 : i32 to vector<1x256xi32>
    %67 = arith.cmpi eq, %3, %66 : vector<1x256xi32>
    %cst_19 = arith.constant 0.953899979 : f32
    %68 = vector.broadcast %cst_19 : f32 to vector<1x256xf32>
    %69 = arith.select %67, %68, %65 : vector<1x256xi1>, vector<1x256xf32>
    %c11_i32 = arith.constant 11 : i32
    %70 = vector.broadcast %c11_i32 : i32 to vector<1x256xi32>
    %71 = arith.cmpi eq, %3, %70 : vector<1x256xi32>
    %cst_20 = arith.constant 9.843000e-01 : f32
    %72 = vector.broadcast %cst_20 : f32 to vector<1x256xf32>
    %73 = arith.select %71, %72, %69 : vector<1x256xi1>, vector<1x256xf32>
    %c12_i32 = arith.constant 12 : i32
    %74 = vector.broadcast %c12_i32 : i32 to vector<1x256xi32>
    %75 = arith.cmpi eq, %3, %74 : vector<1x256xi32>
    %cst_21 = arith.constant 1.111600e+00 : f32
    %76 = vector.broadcast %cst_21 : f32 to vector<1x256xf32>
    %77 = arith.select %75, %76, %73 : vector<1x256xi1>, vector<1x256xf32>
    %c13_i32 = arith.constant 13 : i32
    %78 = vector.broadcast %c13_i32 : i32 to vector<1x256xi32>
    %79 = arith.cmpi eq, %3, %78 : vector<1x256xi32>
    %cst_22 = arith.constant 0.903699994 : f32
    %80 = vector.broadcast %cst_22 : f32 to vector<1x256xf32>
    %81 = arith.select %79, %80, %77 : vector<1x256xi1>, vector<1x256xf32>
    %c14_i32 = arith.constant 14 : i32
    %82 = vector.broadcast %c14_i32 : i32 to vector<1x256xi32>
    %83 = arith.cmpi eq, %3, %82 : vector<1x256xi32>
    %cst_23 = arith.constant 1.086500e+00 : f32
    %84 = vector.broadcast %cst_23 : f32 to vector<1x256xf32>
    %85 = arith.select %83, %84, %81 : vector<1x256xi1>, vector<1x256xf32>
    %c15_i32 = arith.constant 15 : i32
    %86 = vector.broadcast %c15_i32 : i32 to vector<1x256xi32>
    %87 = arith.cmpi eq, %3, %86 : vector<1x256xi32>
    %cst_24 = arith.constant 1.095500e+00 : f32
    %88 = vector.broadcast %cst_24 : f32 to vector<1x256xf32>
    %89 = arith.select %87, %88, %85 : vector<1x256xi1>, vector<1x256xf32>
    %c16_i32 = arith.constant 16 : i32
    %90 = vector.broadcast %c16_i32 : i32 to vector<1x256xi32>
    %91 = arith.cmpi eq, %3, %90 : vector<1x256xi32>
    %cst_25 = arith.constant 1.086500e+00 : f32
    %92 = vector.broadcast %cst_25 : f32 to vector<1x256xf32>
    %93 = arith.select %91, %92, %89 : vector<1x256xi1>, vector<1x256xf32>
    %c17_i32 = arith.constant 17 : i32
    %94 = vector.broadcast %c17_i32 : i32 to vector<1x256xi32>
    %95 = arith.cmpi eq, %3, %94 : vector<1x256xi32>
    %cst_26 = arith.constant 1.152900e+00 : f32
    %96 = vector.broadcast %cst_26 : f32 to vector<1x256xf32>
    %97 = arith.select %95, %96, %93 : vector<1x256xi1>, vector<1x256xf32>
    %c18_i32 = arith.constant 18 : i32
    %98 = vector.broadcast %c18_i32 : i32 to vector<1x256xi32>
    %99 = arith.cmpi eq, %3, %98 : vector<1x256xi32>
    %cst_27 = arith.constant 1.050700e+00 : f32
    %100 = vector.broadcast %cst_27 : f32 to vector<1x256xf32>
    %101 = arith.select %99, %100, %97 : vector<1x256xi1>, vector<1x256xf32>
    %cst_28 = arith.constant 0.000000e+00 : f32
    %102 = vector.broadcast %cst_28 : f32 to vector<1x256xf32>
    %103 = arith.subf %102, %24 : vector<1x256xf32>
    %104 = math.exp %103 : vector<1x256xf32>
    %c0_29 = arith.constant 0 : index
    %c0_30 = arith.constant 0 : index
    %c0_31 = arith.constant 0 : index
    %105 = vector.load %arg4[%c0_29, %c0_30, %c0_31] : memref<1x1x256xf32, #tpu.memory_space<vmem>>, vector<1x1x256xf32>
    %106 = vector.shape_cast %105 : vector<1x1x256xf32> to vector<1x256xf32>
    %107 = vector.shape_cast %104 : vector<1x256xf32> to vector<1x1x256xf32>
    tpu.vector_store %arg4[%c0_29, %c0_30, %c0_31], %107 {strides = array<i32>} : memref<1x1x256xf32, #tpu.memory_space<vmem>>, vector<1x1x256xf32>,
    %108 = arith.mulf %101, %24 : vector<1x256xf32>
    %c0_32 = arith.constant 0 : index
    %c0_33 = arith.constant 0 : index
    %c0_34 = arith.constant 0 : index
    %109 = vector.load %arg5[%c0_32, %c0_33, %c0_34] : memref<1x1x256xf32, #tpu.memory_space<vmem>>, vector<1x1x256xf32>
    %110 = vector.shape_cast %109 : vector<1x1x256xf32> to vector<1x256xf32>
    %111 = vector.shape_cast %108 : vector<1x256xf32> to vector<1x1x256xf32>
    tpu.vector_store %arg5[%c0_32, %c0_33, %c0_34], %111 {strides = array<i32>} : memref<1x1x256xf32, #tpu.memory_space<vmem>>, vector<1x1x256xf32>,
    %c0_35 = arith.constant 0 : index
    %c0_36 = arith.constant 0 : index
    %c0_37 = arith.constant 0 : index
    %112 = vector.load %arg6[%c0_35, %c0_36, %c0_37] : memref<1x1x256xf32, #tpu.memory_space<vmem>>, vector<1x1x256xf32>
    %113 = vector.shape_cast %112 : vector<1x1x256xf32> to vector<1x256xf32>
    %114 = vector.shape_cast %101 : vector<1x256xf32> to vector<1x1x256xf32>
    tpu.vector_store %arg6[%c0_35, %c0_36, %c0_37], %114 {strides = array<i32>} : memref<1x1x256xf32, #tpu.memory_space<vmem>>, vector<1x1x256xf32>,
    return
  }
  func.func @transform_0(%arg0: i32, %arg1: i32) -> (i32, i32, i32) {
    %c0_i32 = arith.constant 0 : i32
    %c0_i32_0 = arith.constant 0 : i32
    return %arg0, %c0_i32, %arg1 : i32, i32, i32
  }
  func.func @transform_1(%arg0: i32, %arg1: i32) -> (i32, i32, i32) {
    %c0_i32 = arith.constant 0 : i32
    %c0_i32_0 = arith.constant 0 : i32
    return %arg0, %c0_i32, %arg1 : i32, i32, i32
  }
  func.func @transform_2(%arg0: i32, %arg1: i32) -> (i32, i32, i32) {
    %c0_i32 = arith.constant 0 : i32
    %c0_i32_0 = arith.constant 0 : i32
    return %arg0, %c0_i32, %arg1 : i32, i32, i32
  }
  func.func @transform_3(%arg0: i32, %arg1: i32) -> (i32, i32, i32) {
    %c0_i32 = arith.constant 0 : i32
    %c0_i32_0 = arith.constant 0 : i32
    return %arg0, %c0_i32, %arg1 : i32, i32, i32
  }
  func.func @transform_4(%arg0: i32, %arg1: i32) -> (i32, i32, i32) {
    %c0_i32 = arith.constant 0 : i32
    %c0_i32_0 = arith.constant 0 : i32
    return %arg0, %c0_i32, %arg1 : i32, i32, i32
  }
}

</mosaic_0001>

<bundles_post_ra>
// kernel: tpu_custom_call.1
= control target key start
LH: loop header
LB: loop body
LE: loop exit
PB: predicated region body
PF: predicated region fallthrough
CT: control target
= control target key end

     0   :  { %10 = vsyncpa [#allocation3], 0  ;;  %s1243_s0 = inlined_call_operand.vmem [shape: f32[2,19,256], index: 0, kind: input, shape index: {}]   ;;  %s1244_s1 = inlined_call_operand.vmem [shape: s32[2,1,256], index: 1, kind: input, shape index: {}]   ;;  %s1245_s2 = inlined_call_operand.hbm [shape: f32[2,1,256], index: 2, kind: output, shape index: {0}]   ;;  %s1246_s3 = inlined_call_operand.hbm [shape: f32[2,1,256], index: 3, kind: output, shape index: {1}]   ;;  %s1247_s4 = inlined_call_operand.hbm [shape: f32[2,1,256], index: 4, kind: output, shape index: {2}]  }
   0x1   :  { %12 = vsyncpa [#allocation3 + $0x1], 0 }
   0x2   :  { %13 = vsyncpa [#allocation5], 0 }
   0x3   :  { %15 = vsyncpa [#allocation5 + $0x1], 0  ;;  %s965_s15 = smov 0   ;;  %s967_s16 = smov 0  }
   0x4   :  { %s969_s17 = smov 0   ;;  %s971_s18 = smov 0  }
   0x5   :  { %s973_s19 = smov 0   ;;  %s975_s20 = smov 0  }
   0x6 LB: > { %s688_s21 = sadd.s32 4294967295, %s937_s20   ;;  %s1248_s22 = sadd.s32 4294967294, %s937_s20   ;;  %s937_s20 = sphi %s975_s20, %s21_s20   ;;  %s933_s19 = sphi %s973_s19, %s1270_s19   ;;  %s929_s18 = sphi %s971_s18, %s1269_s18   ;;  %s925_s17 = sphi %s969_s17, %s1268_s17   ;;  %s921_s16 = sphi %s967_s16, %s1267_s16   ;;  %s917_s15 = sphi %s965_s15, %s1266_s15  }
   0x7   : > { %s33_s23 = sadd.s32 1, %s933_s19  ;;  %s98_s24 = sadd.s32 1, %s925_s17 }
   0x8   : > { %p35_p0 = scmp.ge.s32.totalorder %s33_s23, 2  ;;  %p108_p1 = scmp.ne.s32.totalorder %s925_s17, %s921_s16 }
   0x9   : > { %p109_p2 = scmp.eq.s32.totalorder %s688_s21, 1  ;;  %p114_p3 = scmp.ne.s32.totalorder %s921_s16, %s917_s15 }
   0xa   : > { %s1272_s23 = smov (%p35_p0, %s33_s23), 0  ;;  %p115_p5 = scmp.eq.s32.totalorder %s1248_s22, 1 }
   0xb   : > { %p1007_p4 = por %p109_p2, %p108_p1  ;;  %s93_s26 = ssub.s32 %s933_s19, %s1272_s23 }
   0xc   : > { %p692_p6 = scmp.ge.s32.totalorder %s937_s20, 1  ;;  %p96_p7 = scmp.eq.s32.totalorder %s93_s26, 0 }
   0xd   : > { %p1016_p8 = por %p115_p5, %p114_p3  ;;  %p214_p9 = scmp.lt.s32.totalorder %s937_s20, 3 }
   0xe   : > { %s1022_s28 = scalar_select %p96_p7, %s925_s17, %s98_s24  }
   0xf   : > { %p215_p10 = pnand %p692_p6, %p214_p9 }
  0x11   : > { %218 = sbr.rel (%p215_p10) target bundleno = 153 (0x99), region = 28 }
  0x16   : > { %p263_p11 = scmp.lt.s32.totalorder %s929_s18, 1  ;;  %vm291_vm0 = vcmask 1042432   ;;  %v358_v49 = vlaneseq  ;;  %v939_v58 = vmov 0.0   ;;  %s1249_s12 = sand.u32 1, %s921_s16  }
  0x17   : > { %s1101_s13 = sshll.u32 %s1249_s12, 1  ;;  %s1135_s24 = sshll.u32 %s929_s18, 1 }
  0x18   : > { %s1026_s29 = scalar_select %p263_p11, %s929_s18, 1  ;;  %v359_v55 = vshrl.u32 %v358_v49, 7 }
  0x19   : > { %s261_s14 = scalar_lea.vmem [#allocation6], %s1101_s13  ;;  %s1150_s9 = sand.u32 1, %s688_s21  }
  0x1a   : > { %s712_s30 = smul.u32 48, %s1026_s29  ;;  %s697_s8 = sshll.u32 %s1026_s29, 1 }
  0x1b   : > { %s279_s11 = scalar_lea.vmem %s1244_s1, %s697_s8  ;;  %s254_s8 = scalar_lea.vmem [#allocation4], %s1101_s13 }
  0x1c   : > { %s270_s7 = scalar_lea.vmem %s1243_s0, %s712_s30  ;;  %v1074_v53 = vld [vmem:[%s279_s11] sm:$0x3]  ;;  %s510_s30 = scalar_lea.hbm %s1246_s3, %s1135_s24 }
  0x1d   : > { %v1032_v0 = vld [vmem:[%s270_s7] sm:$0xff]  ;;  %v1034_v1 = vld [vmem:[%s270_s7 + $0x8] sm:$0xff]  ;;  %v1040_v4 = vld [vmem:[%s270_s7 + $0x10] sm:$0xff]  ;;  %vm408_vm1 = vcmp.eq.s32.totalorder %v1074_v53, 0  ;;  %vm410_vm2 = vcmp.eq.s32.totalorder %v1074_v53, 1  ;;  %v363_v61 = vperm.slane %v1074_v53, 1  ;;  %s494_s29 = scalar_lea.hbm %s1245_s2, %s1135_s24 }
  0x1e   : > { %v1036_v2 = vld [vmem:[%s270_s7 + $0x20] sm:$0x7]  ;;  %v1038_v3 = vld [vmem:[%s270_s7 + $0x28] sm:$0x7]  ;;  %v1042_v5 = vld [vmem:[%s270_s7 + $0x18] sm:$0xff]  ;;  %vm412_vm3 = vcmp.eq.s32.totalorder %v1074_v53, 2  ;;  %s526_s7 = scalar_lea.hbm %s1247_s4, %s1135_s24 }
  0x1f   : > { %v292_v6 = vsel %vm291_vm0, %v1036_v2, -inf  ;;  %v301_v7 = vsel %vm291_vm0, %v1038_v3, -inf  ;;  %v409_v59 = vsel %vm408_vm1, 0.8373, %v939_v58  ;;  %vm414_vm4 = vcmp.eq.s32.totalorder %v1074_v53, 3  ;;  %s1146_s18 = sshll.u32 %s254_s8, 4  ;;  %s513_s18 = int_to_ptr.vmem [resolvable:$true] %s1146_s18 }
  0x20   : > { %v293_v8 = vmax.f32 %v1032_v0, %v292_v6  ;;  %v302_v9 = vmax.f32 %v1034_v1, %v301_v7  ;;  %v411_v62 = vsel %vm410_vm2, 0.918, %v409_v59  ;;  %v360_v6 = vadd.s32 8, %v359_v55  ;;  %s1152_s10 = sshll.u32 %s510_s30, 4  ;;  %s1156_s11 = sshll.u32 %s261_s14, 4  ;;  %s515_s10 = int_to_ptr.hbm [resolvable:$true] %s1152_s10 }
  0x21   : > { %v413_v7 = vsel %vm412_vm3, 0.866, %v411_v62  ;;  %vm416_vm5 = vcmp.eq.s32.totalorder %v1074_v53, 4  ;;  %vm418_vm6 = vcmp.eq.s32.totalorder %v1074_v53, 5  ;;  %vm365_vm7 = vcmp.eq.s32.totalorder %v359_v55, %v363_v61  ;;  %1257 = sst [smem:[#allocation9_spill]] %s1156_s11  ;;  %s1158_s26 = sshll.u32 %s526_s7, 4 }
  0x22   : > { %v294_v10 = vmax.f32 %v293_v8, %v1040_v4  ;;  %v303_v11 = vmax.f32 %v302_v9, %v1042_v5  ;;  %v361_v9 = vadd.s32 16, %v359_v55  ;;  %vm420_vm8 = vcmp.eq.s32.totalorder %v1074_v53, 6  ;;  %1258 = sst [smem:[#allocation10_spill]] %s1158_s26  ;;  %s477_s30 = scalar_lea.sflag [#allocation5], %s1150_s9 }
  0x23   : > { %vm422_vm9 = vcmp.eq.s32.totalorder %v1074_v53, 7  ;;  %vm424_vm10 = vcmp.eq.s32.totalorder %v1074_v53, 8  ;;  %vm426_vm11 = vcmp.eq.s32.totalorder %v1074_v53, 9  ;;  %vm428_vm12 = vcmp.eq.s32.totalorder %v1074_v53, 10  ;;  %s813_s5 = sshra.s32 %s515_s10, 4  ;;  %s819_s12 = scalar_lea.hbm %s1246_s3, 4  ;;  %s814_s5 = int_to_ptr.hbm [resolvable:$true] %s813_s5 }
  0x24   : > { %v295_v12 = vrot.slane %v294_v10, 4  ;;  %v304_v13 = vrot.slane %v303_v11, 4  ;;  %vm367_vm13 = vcmp.eq.s32.totalorder %v360_v6, %v363_v61  ;;  %vm430_vm14 = vcmp.eq.s32.totalorder %v1074_v53, 11  ;;  %s815_s6 = scalar_lea.hbm %s814_s5, 2  ;;  %p820_p1 = scmp.lt.s32.totalorder %s814_s5, %s1246_s3 }
  0x25   : > { %vm432_vm15 = vcmp.eq.s32.totalorder %v1074_v53, 12  ;;  %vm369_vm1 = vcmp.eq.s32.totalorder %v361_v9, %v363_v61  ;;  %vm434_vm2 = vcmp.eq.s32.totalorder %v1074_v53, 13  ;;  %p816_p12 = scmp.ne.s32.totalorder %s814_s5, %s815_s6  ;;  %p821_p2 = scmp.lt.s32.totalorder %s819_s12, %s815_s6 }
  0x26   : > { %v296_v14 = vmax.f32 %v294_v10, %v295_v12  ;;  %v305_v15 = vmax.f32 %v303_v11, %v304_v13  ;;  %v415_v10 = vsel %vm414_vm4, 1.0345, %v413_v7  ;;  %v362_v12 = vperm.slane %v1074_v53, 0 }
  0x27   : > { %v417_v13 = vsel %vm416_vm5, 1.0166, %v415_v10  ;;  %vm436_vm4 = vcmp.eq.s32.totalorder %v1074_v53, 14  ;;  %p817_p13 = pnand %p816_p12, %p1007_p4  ;;  %p822_p3 = por %p821_p2, %p820_p1 }
  0x28   : > { %v297_v16 = vrot.slane %v296_v14, 2  ;;  %v306_v17 = vrot.slane %v305_v15, 2  ;;  %vm364_vm3 = vcmp.eq.s32.totalorder %v359_v55, %v362_v12  ;;  %vm366_vm5 = vcmp.eq.s32.totalorder %v360_v6, %v362_v12 }
  0x29   : > { %p818_p0 = pneg %p817_p13 }
  0x2a   : > { %v298_v18 = vmax.f32 %v296_v14, %v297_v16  ;;  %v307_v19 = vmax.f32 %v305_v15, %v306_v17  ;;  %v419_v15 = vsel %vm418_vm6, 0.9969, %v417_v13  ;;  %vm368_vm6 = vcmp.eq.s32.totalorder %v361_v9, %v362_v12 }
  0x2b   : > { %v421_v16 = vsel %vm420_vm8, 0.9754, %v419_v15  ;;  %vm438_vm8 = vcmp.eq.s32.totalorder %v1074_v53, 15  ;;  %p823_p5 = pnand %p822_p3, %p818_p0 }
  0x2c   : > { %v299_v20 = vrot.slane %v298_v18, 1  ;;  %v308_v21 = vrot.slane %v307_v19, 1  ;;  %v423_v17 = vsel %vm422_vm9, 1.0489, %v421_v16  ;;  %vm442_vm9 = vcmp.eq.s32.totalorder %v1074_v53, 17 }
  0x2e   : > { %v1052_v22 = vmax.f32 %v298_v18, %v299_v20  ;;  %v1054_v23 = vmax.f32 %v307_v19, %v308_v21  ;;  %v425_v18 = vsel %vm424_vm10, 0.8786, %v423_v17  ;;  %v699_v20 = vsel %vm365_vm7, 1.0, %v939_v58 }
  0x2f   : > { %v427_v19 = vsel %vm426_vm11, 1.0023, %v425_v18  ;;  %vm440_vm7 = vcmp.eq.s32.totalorder %v1074_v53, 16  ;;  %vm444_vm10 = vcmp.eq.s32.totalorder %v1074_v53, 18  ;;  %vm1117_vm11 = vcmp.lt.s32.totalorder %v358_v49, 256 }
  0x30   : > { %v310_v24 = vsub.f32 %v1032_v0, %v1052_v22  ;;  %v311_v25 = vsub.f32 %v1034_v1, %v1054_v23  ;;  %v312_v26 = vsub.f32 %v1040_v4, %v1052_v22  ;;  %v313_v27 = vsub.f32 %v1042_v5, %v1054_v23 }
  0x31   : > { %v314_v28 = vsub.f32 %v1036_v2, %v1052_v22  ;;  %v315_v29 = vsub.f32 %v1038_v3, %v1054_v23  ;;  %v429_v21 = vsel %vm428_vm12, 0.9539, %v427_v19 }
  0x32   : > { %v316_v30 = vmul.f32 1.442695, %v310_v24  ;;  %v318_v31 = vmul.f32 1.442695, %v311_v25  ;;  %v320_v32 = vmul.f32 1.442695, %v312_v26 }
  0x33   : > { %v322_v33 = vmul.f32 1.442695, %v313_v27  ;;  %v324_v34 = vmul.f32 1.442695, %v314_v28  ;;  %v326_v35 = vmul.f32 1.442695, %v315_v29 }
  0x34   : > { %779 = vpow2.f32 %v316_v30  ;;  %v701_v24 = vsel %vm367_vm13, 1.0, %v939_v58  ;;  %v431_v25 = vsel %vm430_vm14, 0.9843, %v429_v21  ;;  %v703_v30 = vsel %vm369_vm1, 1.0, %v939_v58 }
  0x35   : > { %781 = vpow2.f32 %v318_v31  ;;  %v433_v27 = vsel %vm432_vm15, 1.1116, %v431_v25 }
  0x36   : > { %783 = vpow2.f32 %v320_v32  ;;  %v435_v31 = vsel %vm434_vm2, 0.9037, %v433_v27 }
  0x37   : > { %785 = vpow2.f32 %v322_v33  ;;  %v698_v33 = vsel %vm364_vm3, 1.0, %v939_v58 }
  0x38   : > { %787 = vpow2.f32 %v324_v34  ;;  %v437_v34 = vsel %vm436_vm4, 1.0865, %v435_v31 }
  0x39   : > { %789 = vpow2.f32 %v326_v35 }
  0x3a   : > { %v780_v36 = vpop.eup %779 }
  0x3b   : > { %v782_v37 = vpop.eup %781 }
  0x3c   : > { %v784_v38 = vpop.eup %783 }
  0x3d   : > { %v786_v39 = vpop.eup %785  ;;  %v328_v40 = vadd.f32 %v784_v38, %v780_v36  ;;  %v700_v36 = vsel %vm366_vm5, 1.0, %v939_v58 }
  0x3e   : > { %v788_v41 = vpop.eup %787  ;;  %v337_v42 = vadd.f32 %v786_v39, %v782_v37  ;;  %v439_v37 = vsel %vm438_vm8, 1.0955, %v437_v34  ;;  %v702_v39 = vsel %vm368_vm6, 1.0, %v939_v58 }
  0x3f   : > { %v790_v43 = vpop.eup %789  ;;  %v329_v44 = vsel %vm291_vm0, %v788_v41, 0.0 }
  0x40   : > { %v330_v45 = vadd.f32 %v329_v44, %v328_v40  ;;  %v338_v46 = vsel %vm291_vm0, %v790_v43, 0.0  ;;  %v441_v40 = vsel %vm440_vm7, 1.0865, %v439_v37 }
  0x41   : > { %v339_v47 = vadd.f32 %v338_v46, %v337_v42  ;;  %v443_v44 = vsel %vm442_vm9, 1.1529, %v441_v40 }
  0x42   : > { %v331_v48 = vrot.slane %v330_v45, 4 }
  0x43   : > { %v340_v50 = vrot.slane %v339_v47, 4 }
  0x44   : > { %v332_v51 = vadd.f32 %v331_v48, %v330_v45 }
  0x45   : > { %v341_v52 = vadd.f32 %v340_v50, %v339_v47  ;;  %v445_v47 = vsel %vm444_vm10, 1.0507, %v443_v44 }
  0x46   : > { %v333_v54 = vrot.slane %v332_v51, 2  ;;  %470 = vst.msk [vmem:[%s261_s14] sm:$0x3] %vm1117_vm11, %v445_v47 }
  0x47   : > { %v342_v56 = vrot.slane %v341_v52, 2 }
  0x48   : > { %v334_v57 = vadd.f32 %v333_v54, %v332_v51 }
  0x49   : > { %v343_v60 = vadd.f32 %v342_v56, %v341_v52 }
  0x4a   : > { %v335_v63 = vrot.slane %v334_v57, 1 }
  0x4b   : > { %v344_v8 = vrot.slane %v343_v60, 1 }
  0x4c   : > { %v336_v11 = vadd.f32 %v335_v63, %v334_v57 }
  0x4d   : > { %v345_v14 = vadd.f32 %v344_v8, %v343_v60 }
  0x4e   : > { %791 = vlog2.f32 %v336_v11 }
  0x4f   : > { %793 = vlog2.f32 %v345_v14 }
  0x54   : > { %v792_v26 = vpop.eup %791 }
  0x55   : > { %v794_v28 = vpop.eup %793  ;;  %v347_v29 = vmul.f32 0.6931472, %v792_v26 }
  0x56   : > { %v349_v32 = vmul.f32 0.6931472, %v794_v28 }
  0x57   : > { %v350_v35 = vadd.f32 %v347_v29, %v1052_v22 }
  0x58   : > { %v351_v38 = vadd.f32 %v349_v32, %v1054_v23 }
  0x59   : > { %v352_v22 = vsub.f32 %v1032_v0, %v350_v35  ;;  %v354_v42 = vsub.f32 %v1040_v4, %v350_v35  ;;  %v356_v43 = vsub.f32 %v1036_v2, %v350_v35 }
  0x5a   : > { %v353_v45 = vsub.f32 %v1034_v1, %v351_v38  ;;  %v355_v23 = vsub.f32 %v1042_v5, %v351_v38  ;;  %v357_v46 = vsub.f32 %v1038_v3, %v351_v38 }
  0x5b   : > { %v382_v48 = vmul.f32 %v698_v33, %v352_v22  ;;  %v384_v50 = vmul.f32 %v700_v36, %v354_v42  ;;  %v386_v49 = vmul.f32 %v702_v39, %v356_v43 }
  0x5c   : > { %v383_v0 = vmul.f32 %v699_v20, %v353_v45  ;;  %v385_v4 = vmul.f32 %v701_v24, %v355_v23  ;;  %v387_v51 = vmul.f32 %v703_v30, %v357_v46 }
  0x5d   : > { %v388_v2 = vadd.f32 %v384_v50, %v382_v48  ;;  %v389_v1 = vsel %vm291_vm0, %v386_v49, 0.0 }
  0x5e   : > { %v397_v52 = vadd.f32 %v385_v4, %v383_v0  ;;  %v398_v5 = vsel %vm291_vm0, %v387_v51, 0.0  ;;  %vm455_vm0 = vcmask 1040384  }
  0x5f   : > { %v390_v3 = vadd.f32 %v389_v1, %v388_v2 }
  0x60   : > { %v399_v53 = vadd.f32 %v398_v5, %v397_v52 }
  0x61   : > { %v391_v54 = vrot.slane %v390_v3, 4 }
  0x62   : > { %v400_v55 = vrot.slane %v399_v53, 4 }
  0x63   : > { %v392_v56 = vadd.f32 %v391_v54, %v390_v3 }
  0x64   : > { %v401_v57 = vadd.f32 %v400_v55, %v399_v53 }
  0x65   : > { %v393_v58 = vrot.slane %v392_v56, 2 }
  0x66   : > { %v402_v59 = vrot.slane %v401_v57, 2 }
  0x67   : > { %v394_v60 = vadd.f32 %v393_v58, %v392_v56 }
  0x68   : > { %v403_v61 = vadd.f32 %v402_v59, %v401_v57 }
  0x69   : > { %v395_v62 = vrot.slane %v394_v60, 1 }
  0x6a   : > { %v404_v63 = vrot.slane %v403_v61, 1 }
  0x6b   : > { %v396_v6 = vadd.f32 %v395_v62, %v394_v60 }
  0x6c   : > { %v405_v7 = vadd.f32 %v404_v63, %v403_v61 }
  0x6d   : > { %v406_v8 = vsub.f32 0.0, %v396_v6 }
  0x6e   : > { %v407_v9 = vsub.f32 0.0, %v405_v7 }
  0x6f   : > { %v446_v10 = vsub.f32 0.0, %v406_v8 }
  0x70   : > { %v465_v11 = vrot.slane %v407_v9, 7  ;;  %v447_v12 = vsub.f32 0.0, %v407_v9 }
  0x71   : > { %v448_v13 = vmul.f32 1.442695, %v446_v10 }
  0x72   : > { %v466_v14 = vsel %vm455_vm0, %v406_v8, %v465_v11  ;;  %v450_v15 = vmul.f32 1.442695, %v447_v12 }
  0x73   : > { %795 = vpow2.f32 %v448_v13  ;;  %v468_v16 = vmul.f32 %v466_v14, %v445_v47 }
  0x74   : > { %797 = vpow2.f32 %v450_v15 }
  0x75   : > { %469 = vst.msk [vmem:[%s254_s8] sm:$0x3] %vm1117_vm11, %v468_v16 }
  0x76   : > { %826 = shalt.err (!%p823_p5)
}
  0x77   : > { %s1259_s8 = sld [smem:[#allocation10_spill]]  ;;  %s847_s12 = scalar_lea.hbm %s1247_s4, 4 }
  0x78   : > { %714 = dma.vmem_to_hbm [thread:$0]  (%p1007_p4), %s513_s18, 32, %s515_s10, %s477_s30  }
  0x7d   : > { %s1260_s9 = int_to_ptr.hbm [resolvable:$true] %s1259_s8 }
  0x7e   : > { %s841_s21 = sshra.s32 %s1260_s9, 4  ;;  %s842_s21 = int_to_ptr.hbm [resolvable:$true] %s841_s21 }
  0x7f   : > { %s843_s14 = scalar_lea.hbm %s842_s21, 2  ;;  %p848_p10 = scmp.lt.s32.totalorder %s842_s21, %s1247_s4 }
  0x80   : > { %p844_p6 = scmp.ne.s32.totalorder %s842_s21, %s843_s14  ;;  %p849_p11 = scmp.lt.s32.totalorder %s847_s12, %s843_s14 }
  0x82   : > { %p845_p7 = pnand %p844_p6, %p1007_p4  ;;  %p850_p12 = por %p849_p11, %p848_p10 }
  0x84   : > { %p846_p9 = pneg %p845_p7 }
  0x86   : > { %p851_p13 = pnand %p850_p12, %p846_p9 }
  0x88   : > { %854 = shalt.err (!%p851_p13)
}
  0x89   : > { %s1261_s18 = smov %s1260_s9  ;;  %s1262_s10 = sld [smem:[#allocation9_spill]]  ;;  %v796_v17 = vpop.eup %795 }
  0x8a   : > { %s247_s7 = scalar_lea.vmem [#allocation2], %s1101_s13  ;;  %s498_s14 = sshll.u32 %s494_s29, 4  ;;  %v798_v18 = vpop.eup %797  ;;  %s499_s14 = int_to_ptr.hbm [resolvable:$true] %s498_s14 }
  0x8b   : > { %s496_s9 = sshll.u32 %s247_s7, 4  ;;  %v454_v19 = vrot.slane %v798_v18, 7  ;;  %s1264_s8 = sand.u32 1, %s921_s16   ;;  %s497_s9 = int_to_ptr.vmem [resolvable:$true] %s496_s9 }
  0x8c   : > { %s869_s11 = sshra.s32 %s499_s14, 4  ;;  %s875_s12 = scalar_lea.hbm %s1245_s2, 4  ;;  %s870_s11 = int_to_ptr.hbm [resolvable:$true] %s869_s11 }
  0x8d   : > { %v456_v20 = vsel %vm455_vm0, %v796_v17, %v454_v19  ;;  %s871_s13 = scalar_lea.hbm %s870_s11, 2  ;;  %p876_p3 = scmp.lt.s32.totalorder %s870_s11, %s1245_s2 }
  0x8e   : > { %462 = vst.msk [vmem:[%s247_s7] sm:$0x3] %vm1117_vm11, %v456_v20  ;;  %p872_p0 = scmp.ne.s32.totalorder %s870_s11, %s871_s13  ;;  %p877_p5 = scmp.lt.s32.totalorder %s875_s12, %s871_s13 }
  0x8f   : > { %s1263_s6 = int_to_ptr.vmem [resolvable:$true] %s1262_s10 }
  0x90   : > { %715 = dma.vmem_to_hbm [thread:$0]  (%p1007_p4), %s1263_s6, 32, %s1261_s18, %s477_s30  }
  0x91   : > { %s472_s30 = scalar_lea.sflag [#allocation3], %s1264_s8  ;;  %p873_p1 = pnand %p872_p0, %p1007_p4 }
  0x92   : > { %p878_p6 = por %p877_p5, %p876_p3 }
  0x93   : > { %p874_p2 = pneg %p873_p1 }
  0x95   : > { %p879_p7 = pnand %p878_p6, %p874_p2 }
  0x97   : > { %882 = shalt.err (!%p879_p7)
}
  0x98   : > { %713 = dma.vmem_to_hbm [thread:$0]  (%p1007_p4), %s497_s9, 32, %s499_s14, %s472_s30  }
  0x99 PF: > { %p729_p9 = scmp.ge.s32.totalorder %s937_s20, 2  ;;  %s542_s18 = sand.u32 1, %s917_s15  }
  0x9a   : > { %s543_s10 = scalar_lea.sflag [#allocation3], %s542_s18 }
  0x9b   : > { %p720_p10 = pnand %p729_p9, %p1016_p8 }
  0x9d   : > { %p721_p11 = pneg %p720_p10 }
  0x9f   : > { %908 = dma.done.wait (%p721_p11), %s543_s10, 32  }
  0xa0   : > { %910 = vsyncadd (%p721_p11), %s543_s10, 4294967264  ;;  %s1265_s6 = sadd.s32 4294967294, %s937_s20  }
  0xa1   : > { %s552_s7 = sand.u32 1, %s1265_s6  }
  0xa2   : > { %s553_s22 = scalar_lea.sflag [#allocation5], %s552_s7 }
  0xa3   : > { %912 = dma.done.wait (%p721_p11), %s553_s22, 64  }
  0xa4   : > { %914 = vsyncadd (%p721_p11), %s553_s22, 4294967232  ;;  %s21_s20 = sadd.s32 1, %s937_s20   ;;  %s1266_s15 = smov %s921_s16 }
  0xa5   : > { %p18_p4 = scmp.ge.s32.totalorder %s21_s20, 4   ;;  %s1267_s16 = smov %s925_s17 }
  0xa6   : > { %s1268_s17 = smov %s1022_s28  ;;  %s1269_s18 = smov %s933_s19 }
  0xa7   : > { %s1270_s19 = smov %s1272_s23  ;;  %20 = sbr.rel (!%p18_p4) target bundleno = 6 (0x6), region = 98 }
  0xac   :  { %569 = vsyncpa [#allocation3], 1 }
  0xad   :  { %571 = vsyncpa [#allocation3 + $0x1], 1 }
  0xae   :  { %572 = vsyncpa [#allocation5], 1 }
  0xaf   :  { %574 = vsyncpa [#allocation5 + $0x1], 1 }

</bundles_post_ra>
